<compile_context>
chip_gen: v7x
topology: tpu7x:2x2x1
jax: 0.10.0
libtpu: 0.0.40
codegen_flags: <defaults>
</compile_context>

<pallas_src>
import jax
import jax.numpy as jnp
from jax.experimental import pallas as pl
from jax.experimental.pallas import tpu as pltpu

NEGATIVE_SLOPE = -0.069796234
KSIZE = 3


def _conv_mm_kernel(p_ref, w_ref, o_ref):
    # p_ref: [1, K_pad, tile_m]  im2col patches for one sample / one M tile
    # w_ref: [Cout_pad, K_pad]   conv weight with bias folded into the 1-tap row
    # o_ref: [1, Cout_pad, tile_m]
    acc = jnp.dot(w_ref[...], p_ref[0], preferred_element_type=jnp.float32)
    # torch.where(v > 0, v, v * negative_slope)
    o_ref[0] = jnp.where(acc > 0, acc, acc * NEGATIVE_SLOPE).astype(o_ref.dtype)


def _im2col(x, k_pad, m_pad):
    """x: [N, Cin, D, H, W] -> patches [N, K_pad, M_pad].

    K ordering is (Cin, kd, kh, kw), matching weight.reshape(Cout, Cin*27).
    Row k = Cin*27 is the constant-1 bias tap; remaining K rows and the M tail
    are zero (numerically inert).  Built with concat (no scatter HLOs)."""
    n, cin, d, h, w = x.shape
    do, ho, wo = d - KSIZE + 1, h - KSIZE + 1, w - KSIZE + 1
    m_per = do * ho * wo
    k = cin * KSIZE ** 3

    parts = []
    for kd in range(KSIZE):
        for kh in range(KSIZE):
            for kw in range(KSIZE):
                parts.append(x[:, :, kd:kd + do, kh:kh + ho, kw:kw + wo])
    # [N, Cin, 27, Do, Ho, Wo] -> [N, Cin*27, M]  (M already last: no transpose)
    stacked = jnp.stack(parts, axis=2).reshape(n, k, m_per)

    patches = jnp.concatenate(
        [stacked,
         jnp.ones((n, 1, m_per), x.dtype),                 # bias tap row
         jnp.zeros((n, k_pad - k - 1, m_per), x.dtype)],   # K pad rows
        axis=1)
    if m_pad > m_per:
        patches = jnp.pad(patches, ((0, 0), (0, 0), (0, m_pad - m_per)))
    return patches, (n, do, ho, wo, m_per)


def _pick_tile_m(m_pad):
    # Largest 128-multiple tile (<= 2048) that divides the padded M axis.
    t = 128
    while t * 2 <= min(m_pad, 2048) and m_pad % (t * 2) == 0:
        t *= 2
    return t


def model_forward(x, weight, bias):
    """x: [N, Cin, D, H, W] f32; weight: [Cout, Cin, 3, 3, 3]; bias: [Cout].
    Returns [N, Cout, Do, Ho, Wo] matching the PyTorch module."""
    cout, cin = weight.shape[0], weight.shape[1]
    k = cin * KSIZE ** 3
    k_pad = pl.cdiv(k + 1, 128) * 128            # +1 bias tap row, full K-pass
    cout_pad = pl.cdiv(cout, 8) * 8              # sublane-dense output rows

    n, cin_x, d, h, w = x.shape
    do, ho, wo = d - KSIZE + 1, h - KSIZE + 1, w - KSIZE + 1
    m_per = do * ho * wo
    m_pad = pl.cdiv(m_per, 128) * 128            # lane-dense output columns
    tile_m = _pick_tile_m(m_pad)
    m_tiles = m_pad // tile_m

    patches, _ = _im2col(x, k_pad, m_pad)        # [N, K_pad, M_pad]

    # [Cout_pad, K_pad] with bias folded in at column k (concat, no scatter).
    w_mat = jnp.concatenate(
        [weight.reshape(cout, k).astype(jnp.float32),
         bias.reshape(cout, 1).astype(jnp.float32),
         jnp.zeros((cout, k_pad - k - 1), jnp.float32)],
        axis=1)
    if cout_pad > cout:
        w_mat = jnp.concatenate(
            [w_mat, jnp.zeros((cout_pad - cout, k_pad), jnp.float32)], axis=0)

    patch_bytes = 4 * n * k_pad * m_pad
    out = pl.pallas_call(
        _conv_mm_kernel,
        out_shape=jax.ShapeDtypeStruct((n, cout_pad, m_pad), jnp.float32),
        grid_spec=pltpu.PrefetchScalarGridSpec(
            num_scalar_prefetch=0,
            grid=(n, m_tiles),
            in_specs=[
                pl.BlockSpec((1, k_pad, tile_m), lambda i, j: (i, 0, j)),
                pl.BlockSpec((cout_pad, k_pad), lambda i, j: (0, 0)),
            ],
            out_specs=pl.BlockSpec((1, cout_pad, tile_m), lambda i, j: (i, 0, j)),
        ),
        compiler_params=pltpu.CompilerParams(
            dimension_semantics=("parallel", "parallel")),
        cost_estimate=pl.CostEstimate(
            flops=2 * n * cout * (k + 1) * m_per,        # real contraction length
            transcendentals=0,
            bytes_accessed=(2 * patch_bytes              # im2col write + kernel read
                            + 4 * cout_pad * k_pad
                            + 4 * n * cout_pad * m_pad),
        ),
    )(patches, w_mat)

    # Slice off the Cout / M padding, then a free reshape to NCDHW.
    return out[:, :cout, :m_per].reshape(n, cout, do, ho, wo)


def _reference(x, weight, bias):
    # Pure-JAX reference (lax conv) for a correctness check.
    v1 = jax.lax.conv_general_dilated(
        x, weight, window_strides=(1, 1, 1), padding="VALID",
        dimension_numbers=("NCDHW", "OIDHW", "NCDHW"))
    v1 = v1 + bias.reshape(1, -1, 1, 1, 1)
    return jnp.where(v1 > 0, v1, v1 * NEGATIVE_SLOPE)


if __name__ == "__main__":
    key = jax.random.PRNGKey(0)
    kx, kw, kb = jax.random.split(key, 3)

    # Small shapes consistent with Conv3d(4, 7, 3): N=2, Cin=4, D=H=W=8
    N, CIN, COUT, D = 2, 4, 7, 8
    x = jax.random.normal(kx, (N, CIN, D, D, D), dtype=jnp.float32)

    # Deterministic parameter init (PyTorch-style uniform(-1/sqrt(fan_in), ...))
    fan_in = CIN * KSIZE ** 3
    bound = 1.0 / (fan_in ** 0.5)
    weight = jax.random.uniform(kw, (COUT, CIN, KSIZE, KSIZE, KSIZE),
                                dtype=jnp.float32, minval=-bound, maxval=bound)
    bias = jax.random.uniform(kb, (COUT,), dtype=jnp.float32,
                              minval=-bound, maxval=bound)

    fwd = jax.jit(model_forward)
    out = jax.block_until_ready(fwd(x, weight, bias))
    ref = jax.block_until_ready(_reference(x, weight, bias))

    assert out.shape == (N, COUT, D - 2, D - 2, D - 2), out.shape
    assert jnp.allclose(out, ref, atol=1e-4, rtol=1e-4)
    print("KERNEL_OK")
</pallas_src>

<mosaic_0001>
module attributes {stable_mosaic.version = 11 : i64} {
  func.func @_conv_mm_kernel(%arg0: i32, %arg1: i32, %arg2: memref<1x128x256xf32, #tpu.memory_space<vmem>>, %arg3: memref<8x128xf32, #tpu.memory_space<vmem>>, %arg4: memref<1x8x256xf32, #tpu.memory_space<vmem>>) attributes {dimension_semantics = [#tpu.dimension_semantics<parallel>, #tpu.dimension_semantics<parallel>], iteration_bounds = array<i64: 2, 1>, scalar_prefetch = 0 : i64, scratch_operands = 0 : i64, tpu.core_type = #tpu.core_type<tc>, window_params = [{transform_indices = @transform_0, window_bounds = array<i64: 1, 128, 256>}, {pipeline_mode = #tpu.pipeline_mode<synchronous>, transform_indices = @transform_1, window_bounds = array<i64: 8, 128>}, {transform_indices = @transform_2, window_bounds = array<i64: 1, 8, 256>}]} {
    %c0 = arith.constant 0 : index
    %c0_0 = arith.constant 0 : index
    %0 = vector.load %arg3[%c0, %c0_0] : memref<8x128xf32, #tpu.memory_space<vmem>>, vector<8x128xf32>
    %c0_1 = arith.constant 0 : index
    %c0_2 = arith.constant 0 : index
    %c0_3 = arith.constant 0 : index
    %1 = vector.load %arg2[%c0_1, %c0_2, %c0_3] : memref<1x128x256xf32, #tpu.memory_space<vmem>>, vector<1x128x256xf32>
    %2 = vector.shape_cast %1 : vector<1x128x256xf32> to vector<128x256xf32>
    %cst = arith.constant dense<0.000000e+00> : vector<8x256xf32>
    %3 = tpu.matmul %0, %2, %cst {dimension_numbers = #tpu.dot_dimension_numbers<[1], [0], [0], [1], [0, 0, 1, 1], [], []>} : vector<8x128xf32>, vector<128x256xf32>, vector<8x256xf32> -> vector<8x256xf32>
    %cst_4 = arith.constant 0.000000e+00 : f32
    %4 = vector.broadcast %cst_4 : f32 to vector<8x256xf32>
    %5 = arith.cmpf ogt, %3, %4 : vector<8x256xf32>
    %cst_5 = arith.constant -0.0697962343 : f32
    %6 = vector.broadcast %cst_5 : f32 to vector<8x256xf32>
    %7 = arith.mulf %3, %6 : vector<8x256xf32>
    %8 = arith.select %5, %3, %7 : vector<8x256xi1>, vector<8x256xf32>
    %c0_6 = arith.constant 0 : index
    %c0_7 = arith.constant 0 : index
    %c0_8 = arith.constant 0 : index
    %9 = vector.load %arg4[%c0_6, %c0_7, %c0_8] : memref<1x8x256xf32, #tpu.memory_space<vmem>>, vector<1x8x256xf32>
    %10 = vector.shape_cast %9 : vector<1x8x256xf32> to vector<8x256xf32>
    %11 = vector.shape_cast %8 : vector<8x256xf32> to vector<1x8x256xf32>
    tpu.vector_store %arg4[%c0_6, %c0_7, %c0_8], %11 {strides = array<i32>} : memref<1x8x256xf32, #tpu.memory_space<vmem>>, vector<1x8x256xf32>,
    return
  }
  func.func @transform_0(%arg0: i32, %arg1: i32) -> (i32, i32, i32) {
    %c0_i32 = arith.constant 0 : i32
    %c0_i32_0 = arith.constant 0 : i32
    return %arg0, %c0_i32, %arg1 : i32, i32, i32
  }
  func.func @transform_1(%arg0: i32, %arg1: i32) -> (i32, i32) {
    %c0_i32 = arith.constant 0 : i32
    %c0_i32_0 = arith.constant 0 : i32
    %c0_i32_1 = arith.constant 0 : i32
    return %c0_i32, %c0_i32_0 : i32, i32
  }
  func.func @transform_2(%arg0: i32, %arg1: i32) -> (i32, i32, i32) {
    %c0_i32 = arith.constant 0 : i32
    %c0_i32_0 = arith.constant 0 : i32
    return %arg0, %c0_i32, %arg1 : i32, i32, i32
  }
}

</mosaic_0001>

<bundles_post_ra>
// kernel: model_forward.1
= control target key start
LH: loop header
LB: loop body
LE: loop exit
PB: predicated region body
PF: predicated region fallthrough
CT: control target
= control target key end

     0   :  { %s492_s9 = smov 0   ;;  %s494_s10 = smov 0   ;;  %s566_s0 = inlined_call_operand.vmem [shape: f32[2,128,256], index: 0, kind: input, shape index: {}]   ;;  %s567_s1 = inlined_call_operand.vmem [shape: f32[8,128], index: 1, kind: input, shape index: {}]   ;;  %s568_s2 = inlined_call_operand.vmem [shape: f32[2,8,256], index: 2, kind: output, shape index: {}]  }
   0x1   :  { %s496_s11 = smov 0  }
   0x2 LB: > { %s24_s12 = sadd.s32 1, %s470_s10  ;;  %p386_p0 = scmp.ge.s32.totalorder %s474_s11, 1  ;;  %s474_s11 = sphi %s496_s11, %s12_s11   ;;  %s470_s10 = sphi %s494_s10, %s570_s10   ;;  %s466_s9 = sphi %s492_s9, %s569_s9  }
   0x3   : > { %p26_p1 = scmp.ge.s32.totalorder %s24_s12, 2  ;;  %p133_p2 = scmp.lt.s32.totalorder %s474_s11, 3 }
   0x5   : > { %s572_s12 = smov (%p26_p1, %s24_s12), 0  ;;  %p134_p3 = pnand %p386_p0, %p133_p2 }
   0x6   : > { %p164_p4 = scmp.lt.s32.totalorder (!%p134_p3), %s466_s9, 1  ;;  %v476_v0 = vmov (!%p134_p3), 0.0   ;;  %v183_v49 = vld [vmem:[%s567_s1] sm:$0xff] (!%p134_p3) }
   0x7   : > { %137 = sbr.rel (%p134_p3) target bundleno = 269 (0x10d), region = 28  ;;  %280 = vmatprep.mubr.f32.mxu0 (!%p134_p3), %v476_v0 }
   0xe   : > { %s574_s9 = smov (!%p164_p4, %s466_s9), 1 }
   0xf   : > { %s393_s13 = sshll.u32 %s574_s9, 8  ;;  %s394_s19 = sshll.u32 %s574_s9, 4 }
  0x10   : > { %s516_s16 = scalar_lea.vmem %s566_s0, %s393_s13  ;;  %s181_s22 = scalar_lea.vmem %s568_s2, %s394_s19 }
  0x11   : > { %v185_v1 = vld [vmem:[%s516_s16 + $0x8] sm:$0xff]  ;;  %v187_v2 = vld [vmem:[%s516_s16 + $0x18] sm:$0xff]  ;;  %v184_v3 = vld [vmem:[%s516_s16] sm:$0xff] }
  0x12   : > { %v395_v4 = vpack.c.bf16 %v187_v2, %v185_v1  ;;  %v186_v5 = vld [vmem:[%s516_s16 + $0x10] sm:$0xff]  ;;  %v189_v6 = vld [vmem:[%s516_s16 + $0x28] sm:$0xff]  ;;  %v191_v7 = vld [vmem:[%s516_s16 + $0x38] sm:$0xff] }
  0x13   : > { %v397_v8 = vpack.c.bf16 %v186_v5, %v184_v3  ;;  %v399_v9 = vpack.c.bf16 %v191_v7, %v189_v6  ;;  %v188_v10 = vld [vmem:[%s516_s16 + $0x20] sm:$0xff]  ;;  %v190_v11 = vld [vmem:[%s516_s16 + $0x30] sm:$0xff]  ;;  %v193_v12 = vld [vmem:[%s516_s16 + $0x48] sm:$0xff] }
  0x14   : > { %396 = vmatprep.subr.bf16.mxu0 %v395_v4  ;;  %v195_v13 = vld [vmem:[%s516_s16 + $0x58] sm:$0xff]  ;;  %v401_v14 = vpack.c.bf16 %v190_v11, %v188_v10  ;;  %v192_v16 = vld [vmem:[%s516_s16 + $0x40] sm:$0xff]  ;;  %v194_v17 = vld [vmem:[%s516_s16 + $0x50] sm:$0xff] }
  0x15   : > { %398 = vmatpush1.bf16.msra.mxu0 %v397_v8  ;;  %v403_v15 = vpack.c.bf16 %v195_v13, %v193_v12  ;;  %v197_v18 = vld [vmem:[%s516_s16 + $0x68] sm:$0xff]  ;;  %v199_v19 = vld [vmem:[%s516_s16 + $0x78] sm:$0xff]  ;;  %v405_v20 = vpack.c.bf16 %v194_v17, %v192_v16  ;;  %v196_v22 = vld [vmem:[%s516_s16 + $0x60] sm:$0xff] }
  0x16   : > { %400 = vmatprep.subr.bf16.mxu0 %v399_v9  ;;  %v407_v21 = vpack.c.bf16 %v199_v19, %v197_v18  ;;  %v198_v23 = vld [vmem:[%s516_s16 + $0x70] sm:$0xff]  ;;  %v201_v24 = vld [vmem:[%s516_s16 + $0x88] sm:$0xff]  ;;  %v203_v25 = vld [vmem:[%s516_s16 + $0x98] sm:$0xff] }
  0x17   : > { %v409_v26 = vpack.c.bf16 %v198_v23, %v196_v22  ;;  %v411_v27 = vpack.c.bf16 %v203_v25, %v201_v24  ;;  %v200_v28 = vld [vmem:[%s516_s16 + $0x80] sm:$0xff]  ;;  %v202_v29 = vld [vmem:[%s516_s16 + $0x90] sm:$0xff]  ;;  %v205_v30 = vld [vmem:[%s516_s16 + $0xa8] sm:$0xff] }
  0x18   : > { %v207_v31 = vld [vmem:[%s516_s16 + $0xb8] sm:$0xff]  ;;  %v413_v32 = vpack.c.bf16 %v202_v29, %v200_v28  ;;  %v204_v34 = vld [vmem:[%s516_s16 + $0xa0] sm:$0xff]  ;;  %v206_v35 = vld [vmem:[%s516_s16 + $0xb0] sm:$0xff] }
  0x19   : > { %402 = vmatpush1.bf16.msra.mxu0 %v401_v14  ;;  %v415_v33 = vpack.c.bf16 %v207_v31, %v205_v30  ;;  %v209_v36 = vld [vmem:[%s516_s16 + $0xc8] sm:$0xff]  ;;  %v211_v37 = vld [vmem:[%s516_s16 + $0xd8] sm:$0xff]  ;;  %v417_v38 = vpack.c.bf16 %v206_v35, %v204_v34  ;;  %v208_v40 = vld [vmem:[%s516_s16 + $0xc0] sm:$0xff] }
  0x1a   : > { %404 = vmatprep.subr.bf16.mxu0 %v403_v15  ;;  %v419_v39 = vpack.c.bf16 %v211_v37, %v209_v36  ;;  %v210_v41 = vld [vmem:[%s516_s16 + $0xd0] sm:$0xff]  ;;  %v213_v42 = vld [vmem:[%s516_s16 + $0xe8] sm:$0xff]  ;;  %v215_v43 = vld [vmem:[%s516_s16 + $0xf8] sm:$0xff] }
  0x1b   : > { %v421_v44 = vpack.c.bf16 %v210_v41, %v208_v40  ;;  %v423_v45 = vpack.c.bf16 %v215_v43, %v213_v42  ;;  %v212_v46 = vld [vmem:[%s516_s16 + $0xe0] sm:$0xff]  ;;  %v214_v47 = vld [vmem:[%s516_s16 + $0xf0] sm:$0xff] }
  0x1c   : > { %v425_v48 = vpack.c.bf16 %v214_v47, %v212_v46 }
  0x1d   : > { %406 = vmatpush1.bf16.msra.mxu0 %v405_v20 }
  0x1e   : > { %408 = vmatprep.subr.bf16.mxu0 %v407_v21 }
  0x21   : > { %410 = vmatpush1.bf16.msra.mxu0 %v409_v26 }
  0x22   : > { %412 = vmatprep.subr.bf16.mxu0 %v411_v27 }
  0x25   : > { %414 = vmatpush1.bf16.msra.mxu0 %v413_v32 }
  0x26   : > { %416 = vmatprep.subr.bf16.mxu0 %v415_v33 }
  0x29   : > { %418 = vmatpush1.bf16.msra.mxu0 %v417_v38 }
  0x2a   : > { %420 = vmatprep.subr.bf16.mxu0 %v419_v39 }
  0x2d   : > { %422 = vmatpush1.bf16.msra.mxu0 %v421_v44 }
  0x2e   : > { %424 = vmatprep.subr.bf16.mxu0 %v423_v45 }
  0x31   : > { %426 = vmatpush1.bf16.msra.mxu0 %v425_v48 }
  0x34   : > { %281 = vmatmul.mubr.f32.vlgmr.msra.gmra.mrb[0].mxu0 %v183_v49 }
 0x107   : > { %v282_v50 = vpop.f32.mrb[0].mxu0 }
 0x108   : > { %vm287_vm0 = vcmp.gt.f32.partialorder %v282_v50, 0.0  ;;  %v289_v51 = vmul.f32 -0.069796234, %v282_v50  ;;  %v284_v52 = vpop.f32.mrb[1].mxu0 }
 0x109   : > { %vm288_vm1 = vcmp.gt.f32.partialorder %v284_v52, 0.0  ;;  %v290_v53 = vmul.f32 -0.069796234, %v284_v52 }
 0x10a   : > { %v291_v54 = vsel %vm287_vm0, %v282_v50, %v289_v51 }
 0x10b   : > { %v292_v55 = vsel %vm288_vm1, %v284_v52, %v290_v53  ;;  %293 = vst [vmem:[%s181_s22] sm:$0xff] %v291_v54 }
 0x10c   : > { %294 = vst [vmem:[%s181_s22 + $0x8] sm:$0xff] %v292_v55 }
 0x10d PF: > { %s12_s11 = sadd.s32 1, %s474_s11   ;;  %s569_s9 = smov %s470_s10 }
 0x10e   : > { %p9_p5 = scmp.ge.s32.totalorder %s12_s11, 4   ;;  %s570_s10 = smov %s572_s12 }
 0x110   :  { %11 = sbr.rel (!%p9_p5) target bundleno = 2 (0x2), region = 58 }

</bundles_post_ra>
